<compile_context>
chip_gen: v5e
topology: v5e:2x2
jax: 0.10.0
libtpu: 0.0.40
codegen_flags: <defaults>
</compile_context>

<pallas_src>
import functools

import jax
import jax.numpy as jnp
from jax.experimental import pallas as pl
from jax.experimental.pallas import tpu as pltpu

_BN_EPS = 1e-3
_ACT_DTYPE = jnp.bfloat16      # activations + matmul operands (f32 accumulation)
_TM_FULL_MAX = 512             # M <= this -> single full-M tile, no padding
_TM_SPLIT = 256                # M tile when M is large (early layers)
_VMEM_LIMIT = 48 * 1024 * 1024  # safe on v5e/v6e (128 MiB) and v7x (64 MiB)


def _round_up(n, m):
    return (n + m - 1) // m * m


# ----------------------------------------------------------------------------
# Pallas kernel 1: matmul (bf16 x bf16 -> f32 acc on MXU) + folded-BN + ReLU.
#   Single full-K step (no K grid axis, no accumulator scratch), full-N tile
#   (no weight padding, no output slicing).  Grid is over M tiles only.
# ----------------------------------------------------------------------------
def _mm_bn_relu_kernel(a_ref, b_ref, s_ref, t_ref, o_ref):
    acc = jnp.dot(a_ref[...], b_ref[...], preferred_element_type=jnp.float32)
    y = acc * s_ref[...] + t_ref[...]          # folded BN (eval mode), f32 epilogue
    o_ref[...] = jnp.maximum(y, 0.0).astype(o_ref.dtype)   # ReLU, store bf16


@functools.lru_cache(maxsize=None)
def _get_mm_bn_relu(Mp, K, N, TM):
    grid = (Mp // TM,)
    f = pl.pallas_call(
        _mm_bn_relu_kernel,
        out_shape=jax.ShapeDtypeStruct((Mp, N), _ACT_DTYPE),
        grid_spec=pltpu.PrefetchScalarGridSpec(
            num_scalar_prefetch=0,
            grid=grid,
            in_specs=[
                pl.BlockSpec((TM, K), lambda i: (i, 0)),   # activations (bf16)
                pl.BlockSpec((K, N), lambda i: (0, 0)),    # weights (bf16, resident)
                pl.BlockSpec((1, N), lambda i: (0, 0)),    # BN scale (f32)
                pl.BlockSpec((1, N), lambda i: (0, 0)),    # BN bias  (f32)
            ],
            out_specs=pl.BlockSpec((TM, N), lambda i: (i, 0)),
        ),
        compiler_params=pltpu.CompilerParams(
            dimension_semantics=("parallel",),
            vmem_limit_bytes=_VMEM_LIMIT),
    )
    return jax.jit(f)


def _matmul_bn_relu(a, w, scale, bias):
    M, K = a.shape
    N = w.shape[1]
    if M <= _TM_FULL_MAX:
        TM, Mp = M, M                      # single full-M tile, no padding at all
    else:
        TM = _TM_SPLIT
        Mp = _round_up(M, TM)
        a = jnp.pad(a, ((0, Mp - M), (0, 0)))
    out = _get_mm_bn_relu(Mp, K, N, TM)(a, w, scale, bias)
    return out if Mp == M else out[:M]


# ----------------------------------------------------------------------------
# Pallas kernel 2: window-3, stride-1 pooling (max or sum) along dim 1 (H)
#   (sums accumulate in f32, results stored in the activation dtype)
# ----------------------------------------------------------------------------
@functools.lru_cache(maxsize=None)
def _get_pool3_h(B, H, W, C, op, scale, dtype_name):
    Ho = H - 2
    dtype = jnp.dtype(dtype_name)

    def kernel(x_ref, o_ref):
        x0 = x_ref[0, 0:Ho]
        x1 = x_ref[0, 1:Ho + 1]
        x2 = x_ref[0, 2:Ho + 2]
        if op == "max":
            r = jnp.maximum(jnp.maximum(x0, x1), x2)
        else:
            r = (x0.astype(jnp.float32) + x1.astype(jnp.float32)
                 + x2.astype(jnp.float32))
            if scale != 1.0:
                r = r * jnp.float32(scale)
        o_ref[0] = r.astype(o_ref.dtype)

    f = pl.pallas_call(
        kernel,
        out_shape=jax.ShapeDtypeStruct((B, Ho, W, C), dtype),
        grid_spec=pltpu.PrefetchScalarGridSpec(
            num_scalar_prefetch=0,
            grid=(B,),
            in_specs=[pl.BlockSpec((1, H, W, C), lambda b: (b, 0, 0, 0))],
            out_specs=pl.BlockSpec((1, Ho, W, C), lambda b: (b, 0, 0, 0)),
        ),
        compiler_params=pltpu.CompilerParams(
            dimension_semantics=("parallel",),
            vmem_limit_bytes=_VMEM_LIMIT),
    )
    return jax.jit(f)


def _pool3_along_h(x, op, scale=1.0):
    B, H, W, C = x.shape
    return _get_pool3_h(B, H, W, C, op, float(scale), x.dtype.name)(x)


def _max_pool_3x3_s2(x):
    # nn.MaxPool2d(kernel_size=3, stride=2): separable max; the stride-2
    # decimation and the H<->W transpose are XLA glue on small tensors.
    # TODO(synk): fully fused 3x3/s2 pool (W window + decimation in-kernel)
    # would remove the two transpose round-trips.
    y = _pool3_along_h(x, "max")[:, ::2]
    y = jnp.transpose(y, (0, 2, 1, 3))
    y = _pool3_along_h(y, "max")[:, ::2]
    return jnp.transpose(y, (0, 2, 1, 3))


def _avg_pool_3x3_s1_p1(x):
    # F.avg_pool2d(x, 3, stride=1, padding=1), count_include_pad=True (default).
    xp = jnp.pad(x, ((0, 0), (1, 1), (1, 1), (0, 0)))
    y = _pool3_along_h(xp, "sum")
    y = jnp.transpose(y, (0, 2, 1, 3))
    y = _pool3_along_h(y, "sum", scale=1.0 / 9.0)
    return jnp.transpose(y, (0, 2, 1, 3))


# ----------------------------------------------------------------------------
# Conv + BN + ReLU ("BasicConv2d"): im2col glue (bf16) + fused Pallas matmul
# ----------------------------------------------------------------------------
def _conv_bn_relu(x, p, stride=(1, 1), padding=(0, 0)):
    B, H, W, Cin = x.shape
    kh, kw = p["kh"], p["kw"]
    sh, sw = stride
    ph, pw = padding
    Ho = (H + 2 * ph - kh) // sh + 1
    Wo = (W + 2 * pw - kw) // sw + 1
    Cout = p["w"].shape[1]
    if kh == 1 and kw == 1 and (sh, sw) == (1, 1) and (ph, pw) == (0, 0):
        a = x.reshape(B * H * W, Cin)              # 1x1 conv: no duplication
    else:
        xp = jnp.pad(x, ((0, 0), (ph, ph), (pw, pw), (0, 0))) if (ph or pw) else x
        # TODO(synk): im2col taps are still materialized in HBM by XLA slices +
        # concat; an in-kernel gather (tap index folded into the matmul grid via
        # element-offset BlockSpecs) would remove this kh*kw activation blow-up.
        cols = []
        for dy in range(kh):
            for dx in range(kw):
                cols.append(xp[:, dy:dy + sh * (Ho - 1) + 1:sh,
                               dx:dx + sw * (Wo - 1) + 1:sw, :])
        a = jnp.concatenate(cols, axis=-1) if len(cols) > 1 else cols[0]
        a = a.reshape(B * Ho * Wo, kh * kw * Cin)
    y = _matmul_bn_relu(a, p["w"], p["scale"], p["bias"])
    return y.reshape(B, Ho, Wo, Cout)


# ----------------------------------------------------------------------------
# Deterministic synthetic parameters (shapes match torchvision InceptionV3).
# Weights are pre-reshaped + pre-cast to bf16, BN scale/bias pre-shaped to
# (1, Cout) f32, once at construction time (no per-forward pad/cast glue).
# ----------------------------------------------------------------------------
class _ParamFactory:
    def __init__(self, seed=0):
        self._key = jax.random.PRNGKey(seed)
        self._i = 0

    def conv(self, cin, cout, kh, kw):
        k = jax.random.fold_in(self._key, self._i)
        self._i += 1
        kw_, kg, kb = jax.random.split(k, 3)
        fan_in = cin * kh * kw
        # weight generated as (kh, kw, cin, cout) == permuted PyTorch (cout,cin,kh,kw)
        w = jax.random.normal(kw_, (kh, kw, cin, cout), jnp.float32) * jnp.sqrt(2.0 / fan_in)
        gamma = 1.0 + 0.1 * jax.random.normal(kg, (cout,), jnp.float32)
        beta = 0.02 * jax.random.normal(kb, (cout,), jnp.float32)
        run_mean = jnp.zeros((cout,), jnp.float32)
        run_var = jnp.ones((cout,), jnp.float32)
        scale = gamma / jnp.sqrt(run_var + _BN_EPS)
        bias = beta - run_mean * scale
        return {"w": w.reshape(kh * kw * cin, cout).astype(_ACT_DTYPE),
                "scale": scale.reshape(1, cout),
                "bias": bias.reshape(1, cout),
                "kh": kh, "kw": kw}


# ----------------------------------------------------------------------------
# Inception sub-blocks (torchvision semantics)
# ----------------------------------------------------------------------------
def _inception_a(x, p):
    b1 = _conv_bn_relu(x, p["b1"])
    b5 = _conv_bn_relu(x, p["b5_1"])
    b5 = _conv_bn_relu(b5, p["b5_2"], padding=(2, 2))
    b3 = _conv_bn_relu(x, p["b3d_1"])
    b3 = _conv_bn_relu(b3, p["b3d_2"], padding=(1, 1))
    b3 = _conv_bn_relu(b3, p["b3d_3"], padding=(1, 1))
    bp = _avg_pool_3x3_s1_p1(x)
    bp = _conv_bn_relu(bp, p["bp"])
    return jnp.concatenate([b1, b5, b3, bp], axis=-1)


def _inception_b(x, p):
    b3 = _conv_bn_relu(x, p["b3"], stride=(2, 2))
    d = _conv_bn_relu(x, p["b3d_1"])
    d = _conv_bn_relu(d, p["b3d_2"], padding=(1, 1))
    d = _conv_bn_relu(d, p["b3d_3"], stride=(2, 2))
    bp = _max_pool_3x3_s2(x)
    return jnp.concatenate([b3, d, bp], axis=-1)


def _inception_c(x, p):
    b1 = _conv_bn_relu(x, p["b1"])
    b7 = _conv_bn_relu(x, p["b7_1"])
    b7 = _conv_bn_relu(b7, p["b7_2"], padding=(0, 3))
    b7 = _conv_bn_relu(b7, p["b7_3"], padding=(3, 0))
    d = _conv_bn_relu(x, p["b7d_1"])
    d = _conv_bn_relu(d, p["b7d_2"], padding=(3, 0))
    d = _conv_bn_relu(d, p["b7d_3"], padding=(0, 3))
    d = _conv_bn_relu(d, p["b7d_4"], padding=(3, 0))
    d = _conv_bn_relu(d, p["b7d_5"], padding=(0, 3))
    bp = _avg_pool_3x3_s1_p1(x)
    bp = _conv_bn_relu(bp, p["bp"])
    return jnp.concatenate([b1, b7, d, bp], axis=-1)


def _inception_d(x, p):
    b3 = _conv_bn_relu(x, p["b3_1"])
    b3 = _conv_bn_relu(b3, p["b3_2"], stride=(2, 2))
    b7 = _conv_bn_relu(x, p["b7_1"])
    b7 = _conv_bn_relu(b7, p["b7_2"], padding=(0, 3))
    b7 = _conv_bn_relu(b7, p["b7_3"], padding=(3, 0))
    b7 = _conv_bn_relu(b7, p["b7_4"], stride=(2, 2))
    bp = _max_pool_3x3_s2(x)
    return jnp.concatenate([b3, b7, bp], axis=-1)


def _inception_e(x, p):
    b1 = _conv_bn_relu(x, p["b1"])
    b3 = _conv_bn_relu(x, p["b3_1"])
    b3 = jnp.concatenate([
        _conv_bn_relu(b3, p["b3_2a"], padding=(0, 1)),
        _conv_bn_relu(b3, p["b3_2b"], padding=(1, 0)),
    ], axis=-1)
    d = _conv_bn_relu(x, p["b3d_1"])
    d = _conv_bn_relu(d, p["b3d_2"], padding=(1, 1))
    d = jnp.concatenate([
        _conv_bn_relu(d, p["b3d_3a"], padding=(0, 1)),
        _conv_bn_relu(d, p["b3d_3b"], padding=(1, 0)),
    ], axis=-1)
    bp = _avg_pool_3x3_s1_p1(x)
    bp = _conv_bn_relu(bp, p["bp"])
    return jnp.concatenate([b1, b3, d, bp], axis=-1)


# ----------------------------------------------------------------------------
# InceptionV3 feature extractor
# ----------------------------------------------------------------------------
class InceptionV3:
    """InceptionV3 feature-map extractor (Pallas TPU kernels, synthetic weights)."""
    DEFAULT_BLOCK_INDEX = 3
    BLOCK_INDEX_BY_DIM = {64: 0, 192: 1, 768: 2, 2048: 3}

    def __init__(self, output_blocks=(DEFAULT_BLOCK_INDEX,), resize_input=False,
                 normalize_input=True, seed=0):
        self.resize_input = resize_input
        self.normalize_input = normalize_input
        self.output_blocks = sorted(output_blocks)
        self.last_needed_block = max(output_blocks)
        assert self.last_needed_block <= 3, "Last possible output block index is 3"

        pf = _ParamFactory(seed)
        P = {}
        # block 0
        P["Conv2d_1a_3x3"] = pf.conv(3, 32, 3, 3)
        P["Conv2d_2a_3x3"] = pf.conv(32, 32, 3, 3)
        P["Conv2d_2b_3x3"] = pf.conv(32, 64, 3, 3)
        # block 1
        if self.last_needed_block >= 1:
            P["Conv2d_3b_1x1"] = pf.conv(64, 80, 1, 1)
            P["Conv2d_4a_3x3"] = pf.conv(80, 192, 3, 3)
        # block 2
        if self.last_needed_block >= 2:
            P["Mixed_5b"] = self._make_a(pf, 192, 32)
            P["Mixed_5c"] = self._make_a(pf, 256, 64)
            P["Mixed_5d"] = self._make_a(pf, 288, 64)
            P["Mixed_6a"] = self._make_b(pf, 288)
            P["Mixed_6b"] = self._make_c(pf, 768, 128)
            P["Mixed_6c"] = self._make_c(pf, 768, 160)
            P["Mixed_6d"] = self._make_c(pf, 768, 160)
            P["Mixed_6e"] = self._make_c(pf, 768, 192)
        # block 3
        if self.last_needed_block >= 3:
            P["Mixed_7a"] = self._make_d(pf, 768)
            P["Mixed_7b"] = self._make_e(pf, 1280)
            P["Mixed_7c"] = self._make_e(pf, 2048)

        if self.normalize_input:
            # Fold the input normalization 2*x - 1 into Conv2d_1a_3x3's folded-BN
            # epilogue:  scale*(conv(2x-1)) + bias
            #          = (2*scale)*conv(x) + (bias - scale*sum_K(W)).
            p0 = dict(P["Conv2d_1a_3x3"])
            colsum = jnp.sum(p0["w"].astype(jnp.float32), axis=0, keepdims=True)
            p0["bias"] = p0["bias"] - p0["scale"] * colsum
            p0["scale"] = p0["scale"] * 2.0
            P["Conv2d_1a_3x3"] = p0

        self.params = P

    @staticmethod
    def _make_a(pf, cin, pool_features):
        return {"b1": pf.conv(cin, 64, 1, 1),
                "b5_1": pf.conv(cin, 48, 1, 1), "b5_2": pf.conv(48, 64, 5, 5),
                "b3d_1": pf.conv(cin, 64, 1, 1), "b3d_2": pf.conv(64, 96, 3, 3),
                "b3d_3": pf.conv(96, 96, 3, 3),
                "bp": pf.conv(cin, pool_features, 1, 1)}

    @staticmethod
    def _make_b(pf, cin):
        return {"b3": pf.conv(cin, 384, 3, 3),
                "b3d_1": pf.conv(cin, 64, 1, 1), "b3d_2": pf.conv(64, 96, 3, 3),
                "b3d_3": pf.conv(96, 96, 3, 3)}

    @staticmethod
    def _make_c(pf, cin, c7):
        return {"b1": pf.conv(cin, 192, 1, 1),
                "b7_1": pf.conv(cin, c7, 1, 1), "b7_2": pf.conv(c7, c7, 1, 7),
                "b7_3": pf.conv(c7, 192, 7, 1),
                "b7d_1": pf.conv(cin, c7, 1, 1), "b7d_2": pf.conv(c7, c7, 7, 1),
                "b7d_3": pf.conv(c7, c7, 1, 7), "b7d_4": pf.conv(c7, c7, 7, 1),
                "b7d_5": pf.conv(c7, 192, 1, 7),
                "bp": pf.conv(cin, 192, 1, 1)}

    @staticmethod
    def _make_d(pf, cin):
        return {"b3_1": pf.conv(cin, 192, 1, 1), "b3_2": pf.conv(192, 320, 3, 3),
                "b7_1": pf.conv(cin, 192, 1, 1), "b7_2": pf.conv(192, 192, 1, 7),
                "b7_3": pf.conv(192, 192, 7, 1), "b7_4": pf.conv(192, 192, 3, 3)}

    @staticmethod
    def _make_e(pf, cin):
        return {"b1": pf.conv(cin, 320, 1, 1),
                "b3_1": pf.conv(cin, 384, 1, 1), "b3_2a": pf.conv(384, 384, 1, 3),
                "b3_2b": pf.conv(384, 384, 3, 1),
                "b3d_1": pf.conv(cin, 448, 1, 1), "b3d_2": pf.conv(448, 384, 3, 3),
                "b3d_3a": pf.conv(384, 384, 1, 3), "b3d_3b": pf.conv(384, 384, 3, 1),
                "bp": pf.conv(cin, 192, 1, 1)}

    def __call__(self, inp):
        # inp: (B, 3, H, W) NCHW, values in [0, 1] (same convention as PyTorch).
        x = jnp.transpose(inp.astype(jnp.float32), (0, 2, 3, 1))  # NCHW -> NHWC
        if self.resize_input:
            # glue: bilinear resize, matches F.upsample(align_corners=False)
            x = jax.image.resize(x, (x.shape[0], 299, 299, x.shape[3]),
                                 method="bilinear")
        # Input normalization (2*x - 1) is folded into Conv2d_1a_3x3 at __init__.
        x = x.astype(_ACT_DTYPE)

        P = self.params
        outp = []
        # block 0
        x = _conv_bn_relu(x, P["Conv2d_1a_3x3"], stride=(2, 2))
        x = _conv_bn_relu(x, P["Conv2d_2a_3x3"])
        x = _conv_bn_relu(x, P["Conv2d_2b_3x3"], padding=(1, 1))
        if 0 in self.output_blocks:
            outp.append(jnp.transpose(x, (0, 3, 1, 2)).astype(jnp.float32))
        # block 1
        if self.last_needed_block >= 1:
            x = _max_pool_3x3_s2(x)
            x = _conv_bn_relu(x, P["Conv2d_3b_1x1"])
            x = _conv_bn_relu(x, P["Conv2d_4a_3x3"])
            if 1 in self.output_blocks:
                outp.append(jnp.transpose(x, (0, 3, 1, 2)).astype(jnp.float32))
        # block 2
        if self.last_needed_block >= 2:
            x = _max_pool_3x3_s2(x)
            x = _inception_a(x, P["Mixed_5b"])
            x = _inception_a(x, P["Mixed_5c"])
            x = _inception_a(x, P["Mixed_5d"])
            x = _inception_b(x, P["Mixed_6a"])
            x = _inception_c(x, P["Mixed_6b"])
            x = _inception_c(x, P["Mixed_6c"])
            x = _inception_c(x, P["Mixed_6d"])
            x = _inception_c(x, P["Mixed_6e"])
            if 2 in self.output_blocks:
                outp.append(jnp.transpose(x, (0, 3, 1, 2)).astype(jnp.float32))
        # block 3
        if self.last_needed_block >= 3:
            x = _inception_d(x, P["Mixed_7a"])
            x = _inception_e(x, P["Mixed_7b"])
            x = _inception_e(x, P["Mixed_7c"])
            if 3 in self.output_blocks:
                outp.append(jnp.transpose(x, (0, 3, 1, 2)).astype(jnp.float32))
        return outp


if __name__ == "__main__":
    key = jax.random.PRNGKey(0)
    # 75x75 is the smallest spatial size for which every InceptionV3 stage
    # (down to Mixed_7c) still produces >= 1 output pixel.
    x = jax.random.uniform(key, (2, 3, 75, 75), dtype=jnp.float32)

    model = InceptionV3(output_blocks=[3])   # default: features fed by Mixed_7c
    feats = model(x)
    feats = jax.block_until_ready(feats)

    f3 = feats[0]
    assert f3.shape == (2, 2048, 1, 1), f3.shape
    assert f3.dtype == jnp.float32
    assert bool(jnp.all(jnp.isfinite(f3)))
    print("KERNEL_OK")
</pallas_src>

<mosaic_0001>
module attributes {stable_mosaic.version = 11 : i64} {
  func.func @_mm_bn_relu_kernel(%arg0: i32, %arg1: memref<256x27xbf16, #tpu.memory_space<vmem>>, %arg2: memref<27x32xbf16, #tpu.memory_space<vmem>>, %arg3: memref<1x32xf32, #tpu.memory_space<vmem>>, %arg4: memref<1x32xf32, #tpu.memory_space<vmem>>, %arg5: memref<256x32xbf16, #tpu.memory_space<vmem>>) attributes {dimension_semantics = [#tpu.dimension_semantics<parallel>], iteration_bounds = array<i64: 11>, scalar_prefetch = 0 : i64, scratch_operands = 0 : i64, tpu.core_type = #tpu.core_type<tc>, window_params = [{transform_indices = @transform_0, window_bounds = array<i64: 256, 27>}, {pipeline_mode = #tpu.pipeline_mode<synchronous>, transform_indices = @transform_1, window_bounds = array<i64: 27, 32>}, {pipeline_mode = #tpu.pipeline_mode<synchronous>, transform_indices = @transform_2, window_bounds = array<i64: 1, 32>}, {pipeline_mode = #tpu.pipeline_mode<synchronous>, transform_indices = @transform_3, window_bounds = array<i64: 1, 32>}, {transform_indices = @transform_4, window_bounds = array<i64: 256, 32>}]} {
    %c0 = arith.constant 0 : index
    %c0_0 = arith.constant 0 : index
    %0 = vector.load %arg1[%c0, %c0_0] : memref<256x27xbf16, #tpu.memory_space<vmem>>, vector<256x27xbf16>
    %c0_1 = arith.constant 0 : index
    %c0_2 = arith.constant 0 : index
    %1 = vector.load %arg2[%c0_1, %c0_2] : memref<27x32xbf16, #tpu.memory_space<vmem>>, vector<27x32xbf16>
    %cst = arith.constant dense<0.000000e+00> : vector<256x32xf32>
    %2 = tpu.matmul %0, %1, %cst {dimension_numbers = #tpu.dot_dimension_numbers<[1], [0], [0], [1], [0, 0, 1, 1], [], []>} : vector<256x27xbf16>, vector<27x32xbf16>, vector<256x32xf32> -> vector<256x32xf32>
    %c0_3 = arith.constant 0 : index
    %c0_4 = arith.constant 0 : index
    %3 = vector.load %arg3[%c0_3, %c0_4] : memref<1x32xf32, #tpu.memory_space<vmem>>, vector<1x32xf32>
    %4 = vector.broadcast %3 : vector<1x32xf32> to vector<256x32xf32>
    %5 = arith.mulf %2, %4 : vector<256x32xf32>
    %c0_5 = arith.constant 0 : index
    %c0_6 = arith.constant 0 : index
    %6 = vector.load %arg4[%c0_5, %c0_6] : memref<1x32xf32, #tpu.memory_space<vmem>>, vector<1x32xf32>
    %7 = vector.broadcast %6 : vector<1x32xf32> to vector<256x32xf32>
    %8 = arith.addf %5, %7 : vector<256x32xf32>
    %cst_7 = arith.constant 0.000000e+00 : f32
    %9 = vector.broadcast %cst_7 : f32 to vector<256x32xf32>
    %10 = arith.maximumf %8, %9 : vector<256x32xf32>
    %11 = arith.truncf %10 : vector<256x32xf32> to vector<256x32xbf16>
    %c0_8 = arith.constant 0 : index
    %c0_9 = arith.constant 0 : index
    %12 = vector.load %arg5[%c0_8, %c0_9] : memref<256x32xbf16, #tpu.memory_space<vmem>>, vector<256x32xbf16>
    tpu.vector_store %arg5[%c0_8, %c0_9], %11 {strides = array<i32>} : memref<256x32xbf16, #tpu.memory_space<vmem>>, vector<256x32xbf16>,
    return
  }
  func.func @transform_0(%arg0: i32) -> (i32, i32) {
    %c0_i32 = arith.constant 0 : i32
    %c0_i32_0 = arith.constant 0 : i32
    return %arg0, %c0_i32 : i32, i32
  }
  func.func @transform_1(%arg0: i32) -> (i32, i32) {
    %c0_i32 = arith.constant 0 : i32
    %c0_i32_0 = arith.constant 0 : i32
    %c0_i32_1 = arith.constant 0 : i32
    return %c0_i32, %c0_i32_0 : i32, i32
  }
  func.func @transform_2(%arg0: i32) -> (i32, i32) {
    %c0_i32 = arith.constant 0 : i32
    %c0_i32_0 = arith.constant 0 : i32
    %c0_i32_1 = arith.constant 0 : i32
    return %c0_i32, %c0_i32_0 : i32, i32
  }
  func.func @transform_3(%arg0: i32) -> (i32, i32) {
    %c0_i32 = arith.constant 0 : i32
    %c0_i32_0 = arith.constant 0 : i32
    %c0_i32_1 = arith.constant 0 : i32
    return %c0_i32, %c0_i32_0 : i32, i32
  }
  func.func @transform_4(%arg0: i32) -> (i32, i32) {
    %c0_i32 = arith.constant 0 : i32
    %c0_i32_0 = arith.constant 0 : i32
    return %arg0, %c0_i32 : i32, i32
  }
}

</mosaic_0001>

<bundles_post_ra>
// kernel: tpu_custom_call.1
= control target key start
LH: loop header
LB: loop body
LE: loop exit
PB: predicated region body
PF: predicated region fallthrough
CT: control target
= control target key end

     0   :  { %s867_s15 = smov 0   ;;  %s1074_s0 = inlined_call_operand.vmem [shape: bf16[2816,27], index: 0, kind: input, shape index: {}]   ;;  %s1075_s1 = inlined_call_operand.vmem [shape: bf16[27,32], index: 1, kind: input, shape index: {}]   ;;  %s1076_s2 = inlined_call_operand.vmem [shape: f32[1,32], index: 2, kind: input, shape index: {}]   ;;  %s1077_s3 = inlined_call_operand.vmem [shape: f32[1,32], index: 3, kind: input, shape index: {}]   ;;  %s1078_s4 = inlined_call_operand.vmem [shape: bf16[2816,32], index: 4, kind: output, shape index: {}]  }
   0x1 LB: > { %s699_s16 = sadd.s32 4294967295, %s839_s15   ;;  %p703_p0 = scmp.ge.s32.totalorder %s839_s15, 1  ;;  %s839_s15 = sphi %s867_s15, %s14_s15  }
   0x2   : > { %p163_p1 = scmp.lt.s32.totalorder %s839_s15, 12 }
   0x4   : > { %p164_p2 = pnand %p703_p0, %p163_p1 }
   0x5   : > { %s704_s21 = sshll.u32 (!%p164_p2), %s699_s16, 5 }
   0x6   : > { %167 = sbr.rel (%p164_p2) target bundleno = 223 (0xdf), region = 36  ;;  %p190_p3 = scmp.lt.s32.totalorder (!%p164_p2), %s704_s21, 351 }
   0xb   : > { %v778_v0 = vld [vmem:[%s1075_s1 + $0x8] sm:$0xf]  ;;  %v815_v1 = vld [vmem:[%s1075_s1 + $0x8] sm:$0x30]  ;;  %vm378_vm0 = vcmask 1044480   ;;  %vm379_vm1 = vcmask 1045504  }
   0xc   : > { %v779_v2 = vor.u32 %v815_v1, %v778_v0  ;;  %v841_v3 = vmov 65535   ;;  %s1080_s21 = smov (!%p190_p3, %s704_s21), 351  ;;  %v814_v7 = vld [vmem:[%s1075_s1] sm:$0xff]  ;;  %vm329_vm2 = vcmask 220160   ;;  %vm610_vm3 = vcmask 257024  }
   0xd   : > { %v380_v4 = vsel %vm378_vm0, 4294967295, %v841_v3  ;;  %s705_s24 = sshll.u32 %s1080_s21, 2  ;;  %v929_v24 = vld [vmem:[%s1076_s2] ss:$0 sm:$0xff] }
   0xe   : > { %v381_v5 = vsel %vm379_vm1, %v380_v4, 0  ;;  %s892_s27 = scalar_lea.vmem %s1074_s0, %s705_s24  ;;  %v934_v25 = vld [vmem:[%s1077_s3] ss:$0 sm:$0xff]  ;;  %s945_s8 = scalar_lea.vmem %s1078_s4, %s705_s24 }
   0xf   : > { %v383_v6 = vand.u32 %v779_v2, %v381_v5  ;;  %v798_v8 = vld [vmem:[%s892_s27] sm:$0xff]  ;;  %v799_v12 = vld [vmem:[%s892_s27 + $0x8] sm:$0xff]  ;;  %v800_v16 = vld [vmem:[%s892_s27 + $0x10] sm:$0xff] }
  0x10   : > { %v802_v9 = vld [vmem:[%s892_s27 + $0x20] sm:$0xff]  ;;  %v803_v13 = vld [vmem:[%s892_s27 + $0x28] sm:$0xff]  ;;  %v804_v17 = vld [vmem:[%s892_s27 + $0x30] sm:$0xff] }
  0x11   : > { %391 = vmatpush.bf16.msra.mxu0 %v383_v6  ;;  %816 = vmatpush.bf16.msra.mxu1 %v383_v6  ;;  %v806_v10 = vld [vmem:[%s892_s27 + $0x40] sm:$0xff]  ;;  %v807_v14 = vld [vmem:[%s892_s27 + $0x48] sm:$0xff]  ;;  %v808_v18 = vld [vmem:[%s892_s27 + $0x50] sm:$0xff] }
  0x12   : > { %817 = vmatpush.bf16.msra.mxu2 %v383_v6  ;;  %818 = vmatpush.bf16.msra.mxu3 %v383_v6  ;;  %v810_v11 = vld [vmem:[%s892_s27 + $0x60] sm:$0xff]  ;;  %v811_v15 = vld [vmem:[%s892_s27 + $0x68] sm:$0xff]  ;;  %v812_v19 = vld [vmem:[%s892_s27 + $0x70] sm:$0xff] }
  0x13   : > { %v801_v20 = vld [vmem:[%s892_s27 + $0x18] sm:$0xff] }
  0x14   : > { %v805_v21 = vld [vmem:[%s892_s27 + $0x38] sm:$0xff] }
  0x15   : > { %392 = vmatpush.bf16.msra.mxu0 %v814_v7  ;;  %819 = vmatpush.bf16.msra.mxu1 %v814_v7  ;;  %v809_v22 = vld [vmem:[%s892_s27 + $0x58] sm:$0xff] }
  0x16   : > { %820 = vmatpush.bf16.msra.mxu2 %v814_v7  ;;  %821 = vmatpush.bf16.msra.mxu3 %v814_v7  ;;  %v813_v23 = vld [vmem:[%s892_s27 + $0x78] sm:$0xff] }
  0x18   : > { %780 = vmatmul.msk.bf16.vlgmr.msra.gmra.mxu0 %vm329_vm2, %v798_v8  ;;  %784 = vmatmul.msk.bf16.vlgmr.msra.gmra.mxu1 %vm329_vm2, %v802_v9 }
  0x19   : > { %788 = vmatmul.msk.bf16.vlgmr.msra.gmra.mxu2 %vm329_vm2, %v806_v10  ;;  %792 = vmatmul.msk.bf16.vlgmr.msra.gmra.mxu3 %vm329_vm2, %v810_v11 }
  0x28   : > { %781 = vmatmul.msk.bf16.gmra.mxu0 %vm329_vm2, %v799_v12  ;;  %785 = vmatmul.msk.bf16.gmra.mxu1 %vm329_vm2, %v803_v13 }
  0x29   : > { %789 = vmatmul.msk.bf16.gmra.mxu2 %vm329_vm2, %v807_v14  ;;  %793 = vmatmul.msk.bf16.gmra.mxu3 %vm329_vm2, %v811_v15 }
  0x38   : > { %782 = vmatmul.msk.bf16.gmra.mxu0 %vm329_vm2, %v800_v16  ;;  %786 = vmatmul.msk.bf16.gmra.mxu1 %vm329_vm2, %v804_v17 }
  0x39   : > { %790 = vmatmul.msk.bf16.gmra.mxu2 %vm329_vm2, %v808_v18  ;;  %794 = vmatmul.msk.bf16.gmra.mxu3 %vm329_vm2, %v812_v19 }
  0x48   : > { %783 = vmatmul.msk.bf16.gmra.mxu0 %vm329_vm2, %v801_v20  ;;  %787 = vmatmul.msk.bf16.gmra.mxu1 %vm329_vm2, %v805_v21 }
  0x49   : > { %791 = vmatmul.msk.bf16.gmra.mxu2 %vm329_vm2, %v809_v22  ;;  %795 = vmatmul.msk.bf16.gmra.mxu3 %vm329_vm2, %v813_v23 }
  0x95   : > { %v394_v26 = vpop.f32.mrf.mxu0  ;;  %v414_v27 = vpop.f32.mrf.mxu1 }
  0x96   : > { %v478_v28 = vmul.f32 %v929_v24, %v394_v26  ;;  %v486_v29 = vmul.f32 %v929_v24, %v414_v27 }
  0x98   : > { %v514_v30 = vadd.f32 %v934_v25, %v478_v28  ;;  %v522_v31 = vadd.f32 %v934_v25, %v486_v29 }
  0x9a   : > { %v546_v32 = vmax.f32 %v514_v30, 0.0  ;;  %v554_v33 = vmax.f32 %v522_v31, 0.0 }
  0x9c   : > { %v578_v34 = vpack.c.bf16 %v546_v32, %v546_v32  ;;  %v586_v35 = vpack.c.bf16 %v554_v33, %v554_v33  ;;  %v434_v36 = vpop.f32.mrf.mxu2  ;;  %v454_v37 = vpop.f32.mrf.mxu3 }
  0x9d   : > { %v494_v38 = vmul.f32 %v929_v24, %v434_v36  ;;  %v502_v39 = vmul.f32 %v929_v24, %v454_v37  ;;  %v396_v40 = vpop.f32.mrf.mxu0  ;;  %v416_v41 = vpop.f32.mrf.mxu1 }
  0x9e   : > { %611 = vst.msk [vmem:[%s945_s8] sm:$0xf] %vm610_vm3, %v578_v34  ;;  %v479_v42 = vmul.f32 %v929_v24, %v396_v40  ;;  %v487_v43 = vmul.f32 %v929_v24, %v416_v41 }
  0x9f   : > { %619 = vst.msk [vmem:[%s945_s8 + $0x20] sm:$0xf] %vm610_vm3, %v586_v35  ;;  %v530_v44 = vadd.f32 %v934_v25, %v494_v38  ;;  %v538_v45 = vadd.f32 %v934_v25, %v502_v39 }
  0xa0   : > { %v515_v46 = vadd.f32 %v934_v25, %v479_v42  ;;  %v523_v47 = vadd.f32 %v934_v25, %v487_v43 }
  0xa1   : > { %v562_v48 = vmax.f32 %v530_v44, 0.0  ;;  %v570_v49 = vmax.f32 %v538_v45, 0.0 }
  0xa2   : > { %v547_v50 = vmax.f32 %v515_v46, 0.0  ;;  %v555_v51 = vmax.f32 %v523_v47, 0.0 }
  0xa3   : > { %v594_v52 = vpack.c.bf16 %v562_v48, %v562_v48  ;;  %v602_v53 = vpack.c.bf16 %v570_v49, %v570_v49 }
  0xa4   : > { %v579_v54 = vpack.c.bf16 %v547_v50, %v547_v50  ;;  %v587_v55 = vpack.c.bf16 %v555_v51, %v555_v51  ;;  %v436_v56 = vpop.f32.mrf.mxu2  ;;  %v456_v57 = vpop.f32.mrf.mxu3 }
  0xa5   : > { %627 = vst.msk [vmem:[%s945_s8 + $0x40] sm:$0xf] %vm610_vm3, %v594_v52  ;;  %v495_v58 = vmul.f32 %v929_v24, %v436_v56  ;;  %v503_v59 = vmul.f32 %v929_v24, %v456_v57  ;;  %v399_v60 = vpop.f32.mrf.mxu0  ;;  %v419_v61 = vpop.f32.mrf.mxu1 }
  0xa6   : > { %635 = vst.msk [vmem:[%s945_s8 + $0x60] sm:$0xf] %vm610_vm3, %v602_v53  ;;  %v480_v62 = vmul.f32 %v929_v24, %v399_v60  ;;  %v488_v63 = vmul.f32 %v929_v24, %v419_v61 }
  0xa7   : > { %612 = vst.msk [vmem:[%s945_s8 + $0x4] sm:$0xf] %vm610_vm3, %v579_v54  ;;  %v531_v0 = vadd.f32 %v934_v25, %v495_v58  ;;  %v539_v1 = vadd.f32 %v934_v25, %v503_v59 }
  0xa8   : > { %620 = vst.msk [vmem:[%s945_s8 + $0x24] sm:$0xf] %vm610_vm3, %v587_v55  ;;  %v516_v2 = vadd.f32 %v934_v25, %v480_v62  ;;  %v524_v3 = vadd.f32 %v934_v25, %v488_v63 }
  0xa9   : > { %v563_v4 = vmax.f32 %v531_v0, 0.0  ;;  %v571_v5 = vmax.f32 %v539_v1, 0.0 }
  0xaa   : > { %v548_v6 = vmax.f32 %v516_v2, 0.0  ;;  %v556_v7 = vmax.f32 %v524_v3, 0.0 }
  0xab   : > { %v595_v8 = vpack.c.bf16 %v563_v4, %v563_v4  ;;  %v603_v9 = vpack.c.bf16 %v571_v5, %v571_v5 }
  0xac   : > { %v580_v10 = vpack.c.bf16 %v548_v6, %v548_v6  ;;  %v588_v11 = vpack.c.bf16 %v556_v7, %v556_v7  ;;  %v439_v12 = vpop.f32.mrf.mxu2  ;;  %v459_v13 = vpop.f32.mrf.mxu3 }
  0xad   : > { %628 = vst.msk [vmem:[%s945_s8 + $0x44] sm:$0xf] %vm610_vm3, %v595_v8  ;;  %v496_v14 = vmul.f32 %v929_v24, %v439_v12  ;;  %v504_v15 = vmul.f32 %v929_v24, %v459_v13  ;;  %v401_v16 = vpop.f32.mrf.mxu0  ;;  %v421_v17 = vpop.f32.mrf.mxu1 }
  0xae   : > { %636 = vst.msk [vmem:[%s945_s8 + $0x64] sm:$0xf] %vm610_vm3, %v603_v9  ;;  %v481_v18 = vmul.f32 %v929_v24, %v401_v16  ;;  %v489_v19 = vmul.f32 %v929_v24, %v421_v17 }
  0xaf   : > { %613 = vst.msk [vmem:[%s945_s8 + $0x8] sm:$0xf] %vm610_vm3, %v580_v10  ;;  %v532_v20 = vadd.f32 %v934_v25, %v496_v14  ;;  %v540_v21 = vadd.f32 %v934_v25, %v504_v15 }
  0xb0   : > { %621 = vst.msk [vmem:[%s945_s8 + $0x28] sm:$0xf] %vm610_vm3, %v588_v11  ;;  %v517_v22 = vadd.f32 %v934_v25, %v481_v18  ;;  %v525_v23 = vadd.f32 %v934_v25, %v489_v19 }
  0xb1   : > { %v564_v26 = vmax.f32 %v532_v20, 0.0  ;;  %v572_v27 = vmax.f32 %v540_v21, 0.0 }
  0xb2   : > { %v549_v28 = vmax.f32 %v517_v22, 0.0  ;;  %v557_v29 = vmax.f32 %v525_v23, 0.0 }
  0xb3   : > { %v596_v30 = vpack.c.bf16 %v564_v26, %v564_v26  ;;  %v604_v31 = vpack.c.bf16 %v572_v27, %v572_v27 }
  0xb4   : > { %v581_v32 = vpack.c.bf16 %v549_v28, %v549_v28  ;;  %v589_v33 = vpack.c.bf16 %v557_v29, %v557_v29  ;;  %v441_v34 = vpop.f32.mrf.mxu2  ;;  %v461_v35 = vpop.f32.mrf.mxu3 }
  0xb5   : > { %629 = vst.msk [vmem:[%s945_s8 + $0x48] sm:$0xf] %vm610_vm3, %v596_v30  ;;  %v497_v36 = vmul.f32 %v929_v24, %v441_v34  ;;  %v505_v37 = vmul.f32 %v929_v24, %v461_v35  ;;  %v404_v38 = vpop.f32.mrf.mxu0  ;;  %v424_v39 = vpop.f32.mrf.mxu1 }
  0xb6   : > { %637 = vst.msk [vmem:[%s945_s8 + $0x68] sm:$0xf] %vm610_vm3, %v604_v31  ;;  %v482_v40 = vmul.f32 %v929_v24, %v404_v38  ;;  %v490_v41 = vmul.f32 %v929_v24, %v424_v39 }
  0xb7   : > { %614 = vst.msk [vmem:[%s945_s8 + $0xc] sm:$0xf] %vm610_vm3, %v581_v32  ;;  %v533_v42 = vadd.f32 %v934_v25, %v497_v36  ;;  %v541_v43 = vadd.f32 %v934_v25, %v505_v37 }
  0xb8   : > { %622 = vst.msk [vmem:[%s945_s8 + $0x2c] sm:$0xf] %vm610_vm3, %v589_v33  ;;  %v518_v44 = vadd.f32 %v934_v25, %v482_v40  ;;  %v526_v45 = vadd.f32 %v934_v25, %v490_v41 }
  0xb9   : > { %v565_v46 = vmax.f32 %v533_v42, 0.0  ;;  %v573_v47 = vmax.f32 %v541_v43, 0.0 }
  0xba   : > { %v550_v48 = vmax.f32 %v518_v44, 0.0  ;;  %v558_v49 = vmax.f32 %v526_v45, 0.0 }
  0xbb   : > { %v597_v50 = vpack.c.bf16 %v565_v46, %v565_v46  ;;  %v605_v51 = vpack.c.bf16 %v573_v47, %v573_v47 }
  0xbc   : > { %v582_v52 = vpack.c.bf16 %v550_v48, %v550_v48  ;;  %v590_v53 = vpack.c.bf16 %v558_v49, %v558_v49  ;;  %v444_v54 = vpop.f32.mrf.mxu2  ;;  %v464_v55 = vpop.f32.mrf.mxu3 }
  0xbd   : > { %630 = vst.msk [vmem:[%s945_s8 + $0x4c] sm:$0xf] %vm610_vm3, %v597_v50  ;;  %v498_v56 = vmul.f32 %v929_v24, %v444_v54  ;;  %v506_v57 = vmul.f32 %v929_v24, %v464_v55  ;;  %v406_v58 = vpop.f32.mrf.mxu0  ;;  %v426_v59 = vpop.f32.mrf.mxu1 }
  0xbe   : > { %638 = vst.msk [vmem:[%s945_s8 + $0x6c] sm:$0xf] %vm610_vm3, %v605_v51  ;;  %v483_v60 = vmul.f32 %v929_v24, %v406_v58  ;;  %v491_v61 = vmul.f32 %v929_v24, %v426_v59 }
  0xbf   : > { %615 = vst.msk [vmem:[%s945_s8 + $0x10] sm:$0xf] %vm610_vm3, %v582_v52  ;;  %v534_v62 = vadd.f32 %v934_v25, %v498_v56  ;;  %v542_v63 = vadd.f32 %v934_v25, %v506_v57 }
  0xc0   : > { %623 = vst.msk [vmem:[%s945_s8 + $0x30] sm:$0xf] %vm610_vm3, %v590_v53  ;;  %v519_v0 = vadd.f32 %v934_v25, %v483_v60  ;;  %v527_v1 = vadd.f32 %v934_v25, %v491_v61 }
  0xc1   : > { %v566_v2 = vmax.f32 %v534_v62, 0.0  ;;  %v574_v3 = vmax.f32 %v542_v63, 0.0 }
  0xc2   : > { %v551_v4 = vmax.f32 %v519_v0, 0.0  ;;  %v559_v5 = vmax.f32 %v527_v1, 0.0 }
  0xc3   : > { %v598_v6 = vpack.c.bf16 %v566_v2, %v566_v2  ;;  %v606_v7 = vpack.c.bf16 %v574_v3, %v574_v3 }
  0xc4   : > { %v583_v8 = vpack.c.bf16 %v551_v4, %v551_v4  ;;  %v591_v9 = vpack.c.bf16 %v559_v5, %v559_v5  ;;  %v446_v10 = vpop.f32.mrf.mxu2  ;;  %v466_v11 = vpop.f32.mrf.mxu3 }
  0xc5   : > { %631 = vst.msk [vmem:[%s945_s8 + $0x50] sm:$0xf] %vm610_vm3, %v598_v6  ;;  %v499_v12 = vmul.f32 %v929_v24, %v446_v10  ;;  %v507_v13 = vmul.f32 %v929_v24, %v466_v11  ;;  %v409_v14 = vpop.f32.mrf.mxu0  ;;  %v429_v15 = vpop.f32.mrf.mxu1 }
  0xc6   : > { %639 = vst.msk [vmem:[%s945_s8 + $0x70] sm:$0xf] %vm610_vm3, %v606_v7  ;;  %v484_v16 = vmul.f32 %v929_v24, %v409_v14  ;;  %v492_v17 = vmul.f32 %v929_v24, %v429_v15 }
  0xc7   : > { %616 = vst.msk [vmem:[%s945_s8 + $0x14] sm:$0xf] %vm610_vm3, %v583_v8  ;;  %v535_v18 = vadd.f32 %v934_v25, %v499_v12  ;;  %v543_v19 = vadd.f32 %v934_v25, %v507_v13 }
  0xc8   : > { %624 = vst.msk [vmem:[%s945_s8 + $0x34] sm:$0xf] %vm610_vm3, %v591_v9  ;;  %v520_v20 = vadd.f32 %v934_v25, %v484_v16  ;;  %v528_v21 = vadd.f32 %v934_v25, %v492_v17 }
  0xc9   : > { %v567_v22 = vmax.f32 %v535_v18, 0.0  ;;  %v575_v23 = vmax.f32 %v543_v19, 0.0 }
  0xca   : > { %v552_v26 = vmax.f32 %v520_v20, 0.0  ;;  %v560_v27 = vmax.f32 %v528_v21, 0.0 }
  0xcb   : > { %v599_v28 = vpack.c.bf16 %v567_v22, %v567_v22  ;;  %v607_v29 = vpack.c.bf16 %v575_v23, %v575_v23 }
  0xcc   : > { %v584_v30 = vpack.c.bf16 %v552_v26, %v552_v26  ;;  %v592_v31 = vpack.c.bf16 %v560_v27, %v560_v27  ;;  %v449_v32 = vpop.f32.mrf.mxu2  ;;  %v469_v33 = vpop.f32.mrf.mxu3 }
  0xcd   : > { %632 = vst.msk [vmem:[%s945_s8 + $0x54] sm:$0xf] %vm610_vm3, %v599_v28  ;;  %v500_v34 = vmul.f32 %v929_v24, %v449_v32  ;;  %v508_v35 = vmul.f32 %v929_v24, %v469_v33  ;;  %v411_v36 = vpop.f32.mrf.mxu0  ;;  %v431_v37 = vpop.f32.mrf.mxu1 }
  0xce   : > { %640 = vst.msk [vmem:[%s945_s8 + $0x74] sm:$0xf] %vm610_vm3, %v607_v29  ;;  %v485_v38 = vmul.f32 %v929_v24, %v411_v36  ;;  %v493_v39 = vmul.f32 %v929_v24, %v431_v37 }
  0xcf   : > { %617 = vst.msk [vmem:[%s945_s8 + $0x18] sm:$0xf] %vm610_vm3, %v584_v30  ;;  %v536_v40 = vadd.f32 %v934_v25, %v500_v34  ;;  %v544_v41 = vadd.f32 %v934_v25, %v508_v35 }
  0xd0   : > { %625 = vst.msk [vmem:[%s945_s8 + $0x38] sm:$0xf] %vm610_vm3, %v592_v31  ;;  %v521_v42 = vadd.f32 %v934_v25, %v485_v38  ;;  %v529_v43 = vadd.f32 %v934_v25, %v493_v39 }
  0xd1   : > { %v568_v44 = vmax.f32 %v536_v40, 0.0  ;;  %v576_v45 = vmax.f32 %v544_v41, 0.0 }
  0xd2   : > { %v553_v46 = vmax.f32 %v521_v42, 0.0  ;;  %v561_v47 = vmax.f32 %v529_v43, 0.0 }
  0xd3   : > { %v600_v48 = vpack.c.bf16 %v568_v44, %v568_v44  ;;  %v608_v49 = vpack.c.bf16 %v576_v45, %v576_v45 }
  0xd4   : > { %v585_v50 = vpack.c.bf16 %v553_v46, %v553_v46  ;;  %v593_v51 = vpack.c.bf16 %v561_v47, %v561_v47  ;;  %v451_v52 = vpop.f32.mrf.mxu2  ;;  %v471_v53 = vpop.f32.mrf.mxu3 }
  0xd5   : > { %633 = vst.msk [vmem:[%s945_s8 + $0x58] sm:$0xf] %vm610_vm3, %v600_v48  ;;  %v501_v54 = vmul.f32 %v929_v24, %v451_v52  ;;  %v509_v55 = vmul.f32 %v929_v24, %v471_v53 }
  0xd6   : > { %641 = vst.msk [vmem:[%s945_s8 + $0x78] sm:$0xf] %vm610_vm3, %v608_v49 }
  0xd7   : > { %618 = vst.msk [vmem:[%s945_s8 + $0x1c] sm:$0xf] %vm610_vm3, %v585_v50  ;;  %v537_v56 = vadd.f32 %v934_v25, %v501_v54  ;;  %v545_v57 = vadd.f32 %v934_v25, %v509_v55 }
  0xd8   : > { %626 = vst.msk [vmem:[%s945_s8 + $0x3c] sm:$0xf] %vm610_vm3, %v593_v51 }
  0xd9   : > { %v569_v58 = vmax.f32 %v537_v56, 0.0  ;;  %v577_v59 = vmax.f32 %v545_v57, 0.0 }
  0xdb   : > { %v601_v60 = vpack.c.bf16 %v569_v58, %v569_v58  ;;  %v609_v61 = vpack.c.bf16 %v577_v59, %v577_v59 }
  0xdd   : > { %634 = vst.msk [vmem:[%s945_s8 + $0x5c] sm:$0xf] %vm610_vm3, %v601_v60 }
  0xde   : > { %642 = vst.msk [vmem:[%s945_s8 + $0x7c] sm:$0xf] %vm610_vm3, %v609_v61 }
  0xdf PF: > { %s14_s15 = sadd.s32 1, %s839_s15  }
  0xe0   : > { %p11_p4 = scmp.ge.s32.totalorder %s14_s15, 13  }
  0xe2   :  { %13 = sbr.rel (!%p11_p4) target bundleno = 1 (0x1), region = 66 }

</bundles_post_ra>
